<compile_context>
chip_gen: v7x
topology: tpu7x:2x2x1
jax: 0.10.0
libtpu: 0.0.40
codegen_flags: <defaults>
</compile_context>

<pallas_src>
import jax
import jax.numpy as jnp
from jax.experimental import pallas as pl
from jax.experimental.pallas import tpu as pltpu

_LANES = 128          # vreg lane width
_SUBLANES = 8         # vreg sublane count (f32)
_MAX_TILE_ROWS = 512  # 512x128 f32 = 256 KiB/tile; in+out x 2 pipeline bufs = 1 MiB VMEM


def _relu_kernel(x_ref, o_ref):
    # Elementwise ReLU on a lane-dense VMEM tile (pure VPU max vs scalar 0).
    o_ref[...] = jnp.maximum(x_ref[...], 0.0)


def _relu_2d(x2d: jax.Array, tile_rows: int) -> jax.Array:
    """Tiled lane-dense ReLU. x2d has shape (rows, 128), rows % tile_rows == 0."""
    rows, lanes = x2d.shape
    grid = rows // tile_rows
    itemsize = jnp.dtype(x2d.dtype).itemsize
    return pl.pallas_call(
        _relu_kernel,
        out_shape=jax.ShapeDtypeStruct(x2d.shape, x2d.dtype),
        grid=(grid,),
        in_specs=[pl.BlockSpec((tile_rows, lanes), lambda i: (i, 0))],
        out_specs=pl.BlockSpec((tile_rows, lanes), lambda i: (i, 0)),
        input_output_aliases={0: 0},
        compiler_params=pltpu.CompilerParams(
            dimension_semantics=("parallel",)),
        cost_estimate=pl.CostEstimate(
            flops=rows * lanes,
            transcendentals=0,
            bytes_accessed=2 * rows * lanes * itemsize),
    )(x2d)


@jax.jit
def model_forward(inp: jax.Array) -> jax.Array:
    # Mirrors: input = torch.reshape(input, (-1, 1, 2, 2)); output = relu(input)
    x = jnp.reshape(inp, (-1, 1, 2, 2))
    n = x.size

    # Lane-dense view: flatten, pad to a whole number of (tile_rows, 128) tiles.
    rows = pl.cdiv(n, _LANES)
    rows = pl.cdiv(rows, _SUBLANES) * _SUBLANES          # sublane-aligned
    tile_rows = min(_MAX_TILE_ROWS, rows)                # fixed, VMEM-safe tile
    rows = pl.cdiv(rows, tile_rows) * tile_rows          # whole tiles only
    padded = rows * _LANES

    flat = jnp.pad(x.reshape(-1), (0, padded - n))       # ReLU(0) == 0, padding is harmless
    y2d = _relu_2d(flat.reshape(rows, _LANES), tile_rows)
    return y2d.reshape(-1)[:n].reshape(x.shape)


if __name__ == "__main__":
    key = jax.random.PRNGKey(0)
    # Small input consistent with the reshape to (-1, 1, 2, 2): 8 elements -> (2, 1, 2, 2)
    inp = jax.random.normal(key, (2, 2, 2), dtype=jnp.float32)

    out = model_forward(inp)
    out = jax.block_until_ready(out)

    # Sanity check against plain-JAX reference.
    ref = jnp.maximum(jnp.reshape(inp, (-1, 1, 2, 2)), 0.0)
    assert out.shape == (2, 1, 2, 2), out.shape
    assert out.dtype == ref.dtype, out.dtype
    assert jnp.allclose(out, ref), "mismatch vs reference ReLU"

    print("KERNEL_OK")
</pallas_src>

<mosaic_0001>
module attributes {stable_mosaic.version = 11 : i64} {
  func.func @_relu_kernel(%arg0: i32, %arg1: memref<8x128xf32, #tpu.memory_space<vmem>>, %arg2: memref<8x128xf32, #tpu.memory_space<vmem>>) attributes {dimension_semantics = [#tpu.dimension_semantics<parallel>], iteration_bounds = array<i64: 1>, scalar_prefetch = 0 : i64, scratch_operands = 0 : i64, tpu.core_type = #tpu.core_type<tc>, window_params = [{transform_indices = @transform_0, window_bounds = array<i64: 8, 128>}, {transform_indices = @transform_1, window_bounds = array<i64: 8, 128>}]} {
    %c0 = arith.constant 0 : index
    %c0_0 = arith.constant 0 : index
    %0 = vector.load %arg1[%c0, %c0_0] : memref<8x128xf32, #tpu.memory_space<vmem>>, vector<8x128xf32>
    %cst = arith.constant 0.000000e+00 : f32
    %1 = vector.broadcast %cst : f32 to vector<8x128xf32>
    %2 = arith.maximumf %0, %1 : vector<8x128xf32>
    %c0_1 = arith.constant 0 : index
    %c0_2 = arith.constant 0 : index
    %3 = vector.load %arg2[%c0_1, %c0_2] : memref<8x128xf32, #tpu.memory_space<vmem>>, vector<8x128xf32>
    tpu.vector_store %arg2[%c0_1, %c0_2], %2 {strides = array<i32>} : memref<8x128xf32, #tpu.memory_space<vmem>>, vector<8x128xf32>,
    return
  }
  func.func @transform_0(%arg0: i32) -> (i32, i32) {
    %c0_i32 = arith.constant 0 : i32
    %c0_i32_0 = arith.constant 0 : i32
    return %arg0, %c0_i32 : i32, i32
  }
  func.func @transform_1(%arg0: i32) -> (i32, i32) {
    %c0_i32 = arith.constant 0 : i32
    %c0_i32_0 = arith.constant 0 : i32
    return %arg0, %c0_i32 : i32, i32
  }
}

</mosaic_0001>

<bundles_post_ra>
// kernel: model_forward.1
= control target key start
LH: loop header
LB: loop body
LE: loop exit
PB: predicated region body
PF: predicated region fallthrough
CT: control target
= control target key end

     0   :  { %s31_s0 = inlined_call_operand.vmem [shape: f32[8,128], index: 0, kind: input, shape index: {}, may-alias: {0,1}]   ;;  %s32_s1 = inlined_call_operand.vmem [shape: f32[8,128], index: 1, kind: output, shape index: {}, may-alias: {0,1}]  }
   0x1   :  { %v8_v0 = vld [vmem:[%s31_s0] sm:$0xff] }
   0x2   :  { %v9_v1 = vmax.f32 %v8_v0, 0.0 }
   0x4   :  { %10 = vst [vmem:[%s32_s1] sm:$0xff] %v9_v1 }

</bundles_post_ra>
